<compile_context>
chip_gen: v5e
topology: v5e:2x2
jax: 0.10.0
libtpu: 0.0.40
codegen_flags: <defaults>
</compile_context>

<pallas_src>
import functools
import math

import jax
import jax.numpy as jnp
from jax.experimental import pallas as pl
from jax.experimental.pallas import tpu as pltpu


# ----------------------------- helpers --------------------------------------

def _round_up(a: int, m: int) -> int:
    return (a + m - 1) // m * m


def _gelu_tanh_f32(x):
    # 0.5 * x * (1 + tanh( sqrt(2/pi) * (x + 0.044715 * x^3) ))
    c = math.sqrt(2.0 / math.pi)
    return 0.5 * x * (1.0 + jnp.tanh(c * (x + 0.044715 * x * x * x)))


def _largest_aligned_divisor(total: int, max_tile: int, align: int = 128) -> int:
    """Largest multiple of `align` that divides `total` and is <= max_tile."""
    max_tile = max(align, min(max_tile, total))
    t = max_tile - (max_tile % align)
    while t > align:
        if total % t == 0:
            return t
        t -= align
    return align


# ----------------------- fused MLP kernel (primary path) --------------------

def _fused_mlp_kernel(x_ref, wfc_ref, bfc_ref, wpj_ref, bpj_ref, o_ref):
    """One (tm, C) row tile: h = gelu(x@Wfc+bfc); y = h@Wpj+bpj.

    Weights are resident in VMEM (constant index_map); MXU inputs are bf16,
    accumulation and the epilogue are f32, h never leaves VMEM.
    """
    x = x_ref[...].astype(jnp.bfloat16)
    h = jnp.dot(x, wfc_ref[...], preferred_element_type=jnp.float32)
    h = h + bfc_ref[...].astype(jnp.float32)
    h = _gelu_tanh_f32(h)                                   # f32 epilogue
    y = jnp.dot(h.astype(jnp.bfloat16), wpj_ref[...],
                preferred_element_type=jnp.float32)
    y = y + bpj_ref[...].astype(jnp.float32)
    o_ref[...] = y.astype(o_ref.dtype)


_FUSED_VMEM_BUDGET = 28 * 1024 * 1024   # stay under the 32 MiB scoped default


def _fused_vmem_bytes(tm: int, C: int, H: int) -> int:
    w = 2 * (C * H + H * C)              # resident bf16 weights
    bias = 4 * (H + C)                   # f32 biases
    io = 2 * 2 * (tm * C * 4)            # double-buffered x + out f32 tiles
    hid = tm * H * (4 + 2)               # f32 hidden + bf16 copy headroom
    return w + bias + io + hid


def _choose_fused_tm(M: int, C: int, H: int):
    m_al = _round_up(max(M, 1), 8)
    for tm in (512, 256, 128, 64, 32, 16, 8):
        tm_c = min(tm, m_al)
        if _fused_vmem_bytes(tm_c, C, H) <= _FUSED_VMEM_BUDGET:
            return tm_c
    return None                          # weights too large -> K-tiled fallback


def _fused_mlp_call(x2d, w_fc_bf, b_fc, w_pj_bf, b_pj, *, tm, out_dtype):
    M, C = x2d.shape
    H = w_fc_bf.shape[1]

    Mp = _round_up(M, tm)
    x_p = x2d if Mp == M else jnp.pad(x2d, ((0, Mp - M), (0, 0)))
    grid = (Mp // tm,)

    cost = pl.CostEstimate(
        flops=4 * M * C * H,
        transcendentals=M * H,
        bytes_accessed=4 * M * C * 2 + 2 * (2 * C * H) + 4 * (H + C),
    )

    out = pl.pallas_call(
        _fused_mlp_kernel,
        out_shape=jax.ShapeDtypeStruct((Mp, C), out_dtype),
        grid_spec=pltpu.PrefetchScalarGridSpec(
            num_scalar_prefetch=0,
            grid=grid,
            in_specs=[
                pl.BlockSpec((tm, C), lambda i: (i, 0)),   # x rows
                pl.BlockSpec((C, H), lambda i: (0, 0)),    # w_fc  (resident)
                pl.BlockSpec((1, H), lambda i: (0, 0)),    # b_fc  (resident)
                pl.BlockSpec((H, C), lambda i: (0, 0)),    # w_proj(resident)
                pl.BlockSpec((1, C), lambda i: (0, 0)),    # b_proj(resident)
            ],
            out_specs=pl.BlockSpec((tm, C), lambda i: (i, 0)),
        ),
        compiler_params=pltpu.CompilerParams(
            dimension_semantics=("parallel",)),
        cost_estimate=cost,
    )(x_p, w_fc_bf, b_fc.reshape(1, H), w_pj_bf, b_pj.reshape(1, C))

    return out[:M] if Mp != M else out


# -------------------- K-tiled linear kernel (fallback path) -----------------

def _linear_kernel(x_ref, w_ref, b_ref, o_ref, acc_ref, *, activation):
    """One (tm, tn) output tile; K-reduction over grid axis 2 (bf16 MXU)."""
    k = pl.program_id(2)
    nk = pl.num_programs(2)

    @pl.when(k == 0)
    def _init():
        acc_ref[...] = jnp.zeros_like(acc_ref)

    part = jnp.dot(x_ref[...].astype(jnp.bfloat16),
                   w_ref[...].astype(jnp.bfloat16),
                   preferred_element_type=jnp.float32)

    @pl.when(k < nk - 1)
    def _accumulate():
        acc_ref[...] += part

    @pl.when(k == nk - 1)
    def _finalize():
        # Fold the last partial product straight into the epilogue: saves one
        # (tm, tn) f32 VMEM store+load per output tile.
        y = acc_ref[...] + part + b_ref[...].astype(jnp.float32)
        if activation == "gelu_tanh":
            y = _gelu_tanh_f32(y)
        o_ref[...] = y.astype(o_ref.dtype)


def pallas_linear(x2d, w, b, activation=None, *, tm=512, tn=512, tk_max=1024,
                  out_dtype=None):
    """y = act(x2d @ w + b).  x2d: (N, Cin), w: (Cin, Cout) bf16, b: (Cout,)."""
    N, Cin = x2d.shape
    Cin_w, Cout = w.shape
    assert Cin == Cin_w
    out_dtype = out_dtype if out_dtype is not None else x2d.dtype

    tm = min(tm, _round_up(N, 8))
    tn = min(tn, _round_up(Cout, 128))
    Kp = _round_up(Cin, 128)
    tk = _largest_aligned_divisor(Kp, tk_max, 128)     # no wasted zero K tiles

    Np, Cp = _round_up(N, tm), _round_up(Cout, tn)
    x_p = x2d if (Np == N and Kp == Cin) else jnp.pad(
        x2d, ((0, Np - N), (0, Kp - Cin)))
    w_p = w if (Kp == Cin and Cp == Cout) else jnp.pad(
        w, ((0, Kp - Cin), (0, Cp - Cout)))
    b_p = (b if Cp == Cout else jnp.pad(b, (0, Cp - Cout))).reshape(1, Cp)

    grid = (Np // tm, Cp // tn, Kp // tk)

    cost = pl.CostEstimate(
        flops=2 * N * Cin * Cout,
        transcendentals=(N * Cout if activation == "gelu_tanh" else 0),
        bytes_accessed=(x2d.dtype.itemsize * N * Cin + 2 * Cin * Cout
                        + jnp.dtype(out_dtype).itemsize * N * Cout + 4 * Cout),
    )

    out = pl.pallas_call(
        functools.partial(_linear_kernel, activation=activation),
        out_shape=jax.ShapeDtypeStruct((Np, Cp), out_dtype),
        grid_spec=pltpu.PrefetchScalarGridSpec(
            num_scalar_prefetch=0,
            grid=grid,
            in_specs=[
                pl.BlockSpec((tm, tk), lambda i, j, k: (i, k)),
                pl.BlockSpec((tk, tn), lambda i, j, k: (k, j)),
                pl.BlockSpec((1, tn), lambda i, j, k: (0, j)),
            ],
            out_specs=pl.BlockSpec((tm, tn), lambda i, j, k: (i, j)),
            scratch_shapes=[pltpu.VMEM((tm, tn), jnp.float32)],
        ),
        compiler_params=pltpu.CompilerParams(
            dimension_semantics=("parallel", "parallel", "arbitrary")),
        cost_estimate=cost,
    )(x_p, w_p, b_p)

    if Np != N or Cp != Cout:
        out = out[:N, :Cout]
    return out


# ------------------------------ module wrapper -------------------------------

def mlp_forward(x, params, *, force_tiled=False):
    """Forward pass equivalent to MLP.forward: c_fc -> GELU(tanh) -> c_proj."""
    B, T, C = x.shape
    H = params["w_fc"].shape[1]
    x2d = x.reshape(B * T, C)

    # bf16 weights feed the MXU at native rate; biases stay f32 for the epilogue.
    w_fc = params["w_fc"].astype(jnp.bfloat16)
    w_pj = params["w_proj"].astype(jnp.bfloat16)
    b_fc = params["b_fc"].astype(jnp.float32)
    b_pj = params["b_proj"].astype(jnp.float32)

    tm = None if force_tiled else _choose_fused_tm(B * T, C, H)
    if tm is not None:
        y2d = _fused_mlp_call(x2d, w_fc, b_fc, w_pj, b_pj,
                              tm=tm, out_dtype=x.dtype)
    else:
        # Weights too large for resident VMEM: two K-tiled matmuls, with the
        # hidden activation kept in bf16 to halve its HBM round-trip bytes.
        h = pallas_linear(x2d, w_fc, b_fc, activation="gelu_tanh",
                          out_dtype=jnp.bfloat16)
        y2d = pallas_linear(h, w_pj, b_pj, activation=None, out_dtype=x.dtype)
    return y2d.reshape(B, T, C)


def reference_mlp(x, params):
    """Pure-JAX f32 reference (highest precision) for correctness checking."""
    h = jnp.dot(x, params["w_fc"], precision=jax.lax.Precision.HIGHEST)
    h = h + params["b_fc"]
    h = jax.nn.gelu(h, approximate=True)               # tanh approximation
    y = jnp.dot(h, params["w_proj"], precision=jax.lax.Precision.HIGHEST)
    return y + params["b_proj"]


# ---------------------------------- main -------------------------------------

if __name__ == "__main__":
    # Small config consistent with the module: n_embd=C, hidden=4*C.
    B, T, C = 2, 8, 32
    H = 4 * C

    key = jax.random.PRNGKey(0)
    k_x, k_wf, k_bf, k_wp, k_bp = jax.random.split(key, 5)

    # PyTorch Linear stores (out, in); we store the (in, out) transpose so the
    # kernel computes x @ W + b directly.
    bound_fc = 1.0 / math.sqrt(C)
    bound_pj = 1.0 / math.sqrt(H)
    params = {
        "w_fc":   jax.random.uniform(k_wf, (C, H), jnp.float32, -bound_fc, bound_fc),
        "b_fc":   jax.random.uniform(k_bf, (H,),   jnp.float32, -bound_fc, bound_fc),
        "w_proj": jax.random.uniform(k_wp, (H, C), jnp.float32, -bound_pj, bound_pj),
        "b_proj": jax.random.uniform(k_bp, (C,),   jnp.float32, -bound_pj, bound_pj),
    }

    x = jax.random.normal(k_x, (B, T, C), jnp.float32)

    y_ref = jax.block_until_ready(reference_mlp(x, params))

    # Primary path: fully fused, weight-stationary kernel.
    y_fused = jax.block_until_ready(mlp_forward(x, params))
    assert y_fused.shape == (B, T, C)
    assert jnp.allclose(y_fused, y_ref, atol=2e-2, rtol=2e-2), \
        "fused kernel mismatch vs reference"

    # Fallback path (K-tiled linears) exercised as well for coverage.
    y_tiled = jax.block_until_ready(mlp_forward(x, params, force_tiled=True))
    assert y_tiled.shape == (B, T, C)
    assert jnp.allclose(y_tiled, y_ref, atol=2e-2, rtol=2e-2), \
        "tiled kernel mismatch vs reference"

    print("KERNEL_OK")
</pallas_src>

<mosaic_0001>
module attributes {stable_mosaic.version = 11 : i64} {
  func.func @_fused_mlp_kernel(%arg0: i32, %arg1: memref<16x32xf32, #tpu.memory_space<vmem>>, %arg2: memref<32x128xbf16, #tpu.memory_space<vmem>>, %arg3: memref<1x128xf32, #tpu.memory_space<vmem>>, %arg4: memref<128x32xbf16, #tpu.memory_space<vmem>>, %arg5: memref<1x32xf32, #tpu.memory_space<vmem>>, %arg6: memref<16x32xf32, #tpu.memory_space<vmem>>) attributes {dimension_semantics = [#tpu.dimension_semantics<parallel>], iteration_bounds = array<i64: 1>, scalar_prefetch = 0 : i64, scratch_operands = 0 : i64, tpu.core_type = #tpu.core_type<tc>, window_params = [{transform_indices = @transform_0, window_bounds = array<i64: 16, 32>}, {pipeline_mode = #tpu.pipeline_mode<synchronous>, transform_indices = @transform_1, window_bounds = array<i64: 32, 128>}, {pipeline_mode = #tpu.pipeline_mode<synchronous>, transform_indices = @transform_2, window_bounds = array<i64: 1, 128>}, {pipeline_mode = #tpu.pipeline_mode<synchronous>, transform_indices = @transform_3, window_bounds = array<i64: 128, 32>}, {pipeline_mode = #tpu.pipeline_mode<synchronous>, transform_indices = @transform_4, window_bounds = array<i64: 1, 32>}, {transform_indices = @transform_5, window_bounds = array<i64: 16, 32>}]} {
    %c0 = arith.constant 0 : index
    %c0_0 = arith.constant 0 : index
    %0 = vector.load %arg1[%c0, %c0_0] : memref<16x32xf32, #tpu.memory_space<vmem>>, vector<16x32xf32>
    %1 = arith.truncf %0 : vector<16x32xf32> to vector<16x32xbf16>
    %c0_1 = arith.constant 0 : index
    %c0_2 = arith.constant 0 : index
    %2 = vector.load %arg2[%c0_1, %c0_2] : memref<32x128xbf16, #tpu.memory_space<vmem>>, vector<32x128xbf16>
    %cst = arith.constant dense<0.000000e+00> : vector<16x128xf32>
    %3 = tpu.matmul %1, %2, %cst {dimension_numbers = #tpu.dot_dimension_numbers<[1], [0], [0], [1], [0, 0, 1, 1], [], []>} : vector<16x32xbf16>, vector<32x128xbf16>, vector<16x128xf32> -> vector<16x128xf32>
    %c0_3 = arith.constant 0 : index
    %c0_4 = arith.constant 0 : index
    %4 = vector.load %arg3[%c0_3, %c0_4] : memref<1x128xf32, #tpu.memory_space<vmem>>, vector<1x128xf32>
    %5 = vector.broadcast %4 : vector<1x128xf32> to vector<16x128xf32>
    %6 = arith.addf %3, %5 : vector<16x128xf32>
    %cst_5 = arith.constant 5.000000e-01 : f32
    %7 = vector.broadcast %cst_5 : f32 to vector<16x128xf32>
    %8 = arith.mulf %7, %6 : vector<16x128xf32>
    %cst_6 = arith.constant 4.471500e-02 : f32
    %9 = vector.broadcast %cst_6 : f32 to vector<16x128xf32>
    %10 = arith.mulf %9, %6 : vector<16x128xf32>
    %11 = arith.mulf %10, %6 : vector<16x128xf32>
    %12 = arith.mulf %11, %6 : vector<16x128xf32>
    %13 = arith.addf %6, %12 : vector<16x128xf32>
    %cst_7 = arith.constant 0.797884583 : f32
    %14 = vector.broadcast %cst_7 : f32 to vector<16x128xf32>
    %15 = arith.mulf %14, %13 : vector<16x128xf32>
    %16 = math.tanh %15 : vector<16x128xf32>
    %cst_8 = arith.constant 1.000000e+00 : f32
    %17 = vector.broadcast %cst_8 : f32 to vector<16x128xf32>
    %18 = arith.addf %17, %16 : vector<16x128xf32>
    %19 = arith.mulf %8, %18 : vector<16x128xf32>
    %20 = arith.truncf %19 : vector<16x128xf32> to vector<16x128xbf16>
    %c0_9 = arith.constant 0 : index
    %c0_10 = arith.constant 0 : index
    %21 = vector.load %arg4[%c0_9, %c0_10] : memref<128x32xbf16, #tpu.memory_space<vmem>>, vector<128x32xbf16>
    %cst_11 = arith.constant dense<0.000000e+00> : vector<16x32xf32>
    %22 = tpu.matmul %20, %21, %cst_11 {dimension_numbers = #tpu.dot_dimension_numbers<[1], [0], [0], [1], [0, 0, 1, 1], [], []>} : vector<16x128xbf16>, vector<128x32xbf16>, vector<16x32xf32> -> vector<16x32xf32>
    %c0_12 = arith.constant 0 : index
    %c0_13 = arith.constant 0 : index
    %23 = vector.load %arg5[%c0_12, %c0_13] : memref<1x32xf32, #tpu.memory_space<vmem>>, vector<1x32xf32>
    %24 = vector.broadcast %23 : vector<1x32xf32> to vector<16x32xf32>
    %25 = arith.addf %22, %24 : vector<16x32xf32>
    %c0_14 = arith.constant 0 : index
    %c0_15 = arith.constant 0 : index
    %26 = vector.load %arg6[%c0_14, %c0_15] : memref<16x32xf32, #tpu.memory_space<vmem>>, vector<16x32xf32>
    tpu.vector_store %arg6[%c0_14, %c0_15], %25 {strides = array<i32>} : memref<16x32xf32, #tpu.memory_space<vmem>>, vector<16x32xf32>,
    return
  }
  func.func @transform_0(%arg0: i32) -> (i32, i32) {
    %c0_i32 = arith.constant 0 : i32
    %c0_i32_0 = arith.constant 0 : i32
    return %arg0, %c0_i32 : i32, i32
  }
  func.func @transform_1(%arg0: i32) -> (i32, i32) {
    %c0_i32 = arith.constant 0 : i32
    %c0_i32_0 = arith.constant 0 : i32
    %c0_i32_1 = arith.constant 0 : i32
    return %c0_i32, %c0_i32_0 : i32, i32
  }
  func.func @transform_2(%arg0: i32) -> (i32, i32) {
    %c0_i32 = arith.constant 0 : i32
    %c0_i32_0 = arith.constant 0 : i32
    %c0_i32_1 = arith.constant 0 : i32
    return %c0_i32, %c0_i32_0 : i32, i32
  }
  func.func @transform_3(%arg0: i32) -> (i32, i32) {
    %c0_i32 = arith.constant 0 : i32
    %c0_i32_0 = arith.constant 0 : i32
    %c0_i32_1 = arith.constant 0 : i32
    return %c0_i32, %c0_i32_0 : i32, i32
  }
  func.func @transform_4(%arg0: i32) -> (i32, i32) {
    %c0_i32 = arith.constant 0 : i32
    %c0_i32_0 = arith.constant 0 : i32
    %c0_i32_1 = arith.constant 0 : i32
    return %c0_i32, %c0_i32_0 : i32, i32
  }
  func.func @transform_5(%arg0: i32) -> (i32, i32) {
    %c0_i32 = arith.constant 0 : i32
    %c0_i32_0 = arith.constant 0 : i32
    return %arg0, %c0_i32 : i32, i32
  }
}

</mosaic_0001>

<bundles_post_ra>
// kernel: tpu_custom_call.1
= control target key start
LH: loop header
LB: loop body
LE: loop exit
PB: predicated region body
PF: predicated region fallthrough
CT: control target
= control target key end

     0   :  { %s351_s0 = inlined_call_operand.vmem [shape: f32[16,32], index: 0, kind: input, shape index: {}]   ;;  %s352_s1 = inlined_call_operand.vmem [shape: bf16[32,128], index: 1, kind: input, shape index: {}]   ;;  %s353_s2 = inlined_call_operand.vmem [shape: f32[1,128], index: 2, kind: input, shape index: {}]   ;;  %s354_s3 = inlined_call_operand.vmem [shape: bf16[128,32], index: 3, kind: input, shape index: {}]   ;;  %s355_s4 = inlined_call_operand.vmem [shape: f32[1,32], index: 4, kind: input, shape index: {}]   ;;  %s356_s5 = inlined_call_operand.hbm [shape: f32[16,32], index: 5, kind: output, shape index: {}]  }
   0x1   :  { %v226_v0 = vld [vmem:[%s352_s1 + $0x8] sm:$0xff]  ;;  %v225_v1 = vld [vmem:[%s352_s1] sm:$0xff] }
   0x2   :  { %v22_v2 = vld [vmem:[%s351_s0] sm:$0xff]  ;;  %55 = vmatpush.bf16.msra.mxu0 %v226_v0  ;;  %v23_v3 = vld [vmem:[%s351_s0 + $0x8] sm:$0xff] }
   0x3   :  { %10 = vsyncpa [#allocation3], 0  ;;  %v24_v4 = vpack.c.bf16 %v23_v3, %v22_v2  ;;  %vm45_vm0 = vcmask 261120   ;;  %v234_v5 = vld [vmem:[%s354_s3 + $0x38] sm:$0xff]  ;;  %v233_v6 = vld [vmem:[%s354_s3 + $0x30] sm:$0xff]  ;;  %s270_s17 = smov [#allocation2]  }
   0x4   :  { %150 = vmatpush.bf16.msra.mxu1 %v234_v5  ;;  %v232_v7 = vld [vmem:[%s354_s3 + $0x28] sm:$0xff]  ;;  %v231_v8 = vld [vmem:[%s354_s3 + $0x20] sm:$0xff]  ;;  %v230_v9 = vld [vmem:[%s354_s3 + $0x18] sm:$0xff]  ;;  %s170_s18 = sshll.u32 %s270_s17, 4  ;;  %s172_s21 = sshll.u32 %s356_s5, 4  ;;  %s171_s18 = int_to_ptr.vmem [resolvable:$true] %s170_s18  ;;  %s173_s21 = int_to_ptr.hbm [resolvable:$true] %s172_s21 }
   0x5   :  { %v229_v10 = vld [vmem:[%s354_s3 + $0x10] sm:$0xff]  ;;  %v228_v11 = vld [vmem:[%s354_s3 + $0x8] sm:$0xff]  ;;  %v227_v12 = vld [vmem:[%s354_s3] sm:$0xff]  ;;  %s271_s22 = smov 128   ;;  %s272_s23 = smov 8  }
   0x6   :  { %56 = vmatpush.bf16.msra.mxu0 %v225_v1  ;;  %v238_v13 = vld [vmem:[%s353_s2] ss:$0 sm:$0xff] }
   0x7   :  { %v239_v37 = vld [vmem:[%s355_s4] ss:$0 sm:$0xff] }
   0x8   :  { %151 = vmatpush.bf16.msra.mxu1 %v233_v6 }
   0x9   :  { %192 = vmatmul.msk.bf16.vlgmr.msra.gmra.mxu0 %vm45_vm0, %v24_v4 }
   0xc   :  { %152 = vmatpush.bf16.msra.mxu1 %v232_v7 }
  0x10   :  { %153 = vmatpush.bf16.msra.mxu1 %v231_v8 }
  0x14   :  { %154 = vmatpush.bf16.msra.mxu1 %v230_v9 }
  0x18   :  { %155 = vmatpush.bf16.msra.mxu1 %v229_v10 }
  0x1c   :  { %156 = vmatpush.bf16.msra.mxu1 %v228_v11 }
  0x20   :  { %157 = vmatpush.bf16.msra.mxu1 %v227_v12 }
  0x86   :  { %v58_v14 = vpop.f32.mrf.mxu0 }
  0x87   :  { %v59_v15 = vadd.f32 %v238_v13, %v58_v14 }
  0x89   :  { %v65_v16 = vmul.f32 0.044715, %v59_v15  ;;  %v63_v31 = vmul.f32 0.5, %v59_v15 }
  0x8b   :  { %v67_v17 = vmul.f32 %v65_v16, %v59_v15 }
  0x8d   :  { %v69_v18 = vmul.f32 %v67_v17, %v59_v15 }
  0x8e   :  { %v60_v19 = vpop.f32.mrf.mxu0 }
  0x8f   :  { %v61_v20 = vadd.f32 %v238_v13, %v60_v19  ;;  %v71_v21 = vadd.f32 %v69_v18, %v59_v15 }
  0x91   :  { %v66_v22 = vmul.f32 0.044715, %v61_v20  ;;  %v73_v24 = vmul.f32 0.7978846, %v71_v21  ;;  %v64_v32 = vmul.f32 0.5, %v61_v20 }
  0x93   :  { %v68_v23 = vmul.f32 %v66_v22, %v61_v20  ;;  %240 = vtanh.f32 %v73_v24 }
  0x95   :  { %v70_v25 = vmul.f32 %v68_v23, %v61_v20 }
  0x97   :  { %v72_v26 = vadd.f32 %v70_v25, %v61_v20 }
  0x99   :  { %v74_v27 = vmul.f32 0.7978846, %v72_v26  ;;  %v241_v28 = vpop.eup %240 }
  0x9a   :  { %v77_v29 = vadd.f32 1.0, %v241_v28 }
  0x9b   :  { %242 = vtanh.f32 %v74_v27 }
  0x9c   :  { %v79_v34 = vmul.f32 %v77_v29, %v63_v31 }
  0xa1   :  { %v243_v30 = vpop.eup %242 }
  0xa2   :  { %v78_v33 = vadd.f32 1.0, %v243_v30 }
  0xa4   :  { %v80_v35 = vmul.f32 %v78_v33, %v64_v32 }
  0xa6   :  { %v81_v36 = vpack.c.bf16 %v80_v35, %v79_v34 }
  0xa8   :  { %158 = vmatmul.bf16.vlgmr.msra.gmra.mxu1 %v81_v36 }
 0x125   :  { %v159_v38 = vpop.f32.mrf.mxu1 }
 0x126   :  { %v160_v39 = vadd.f32 %v239_v37, %v159_v38 }
 0x128   :  { %164 = vst.msk [vmem:[#allocation2] sm:$0xff] %vm45_vm0, %v160_v39 }
 0x12d   :  { %v161_v40 = vpop.f32.mrf.mxu1 }
 0x12e   :  { %v162_v41 = vadd.f32 %v239_v37, %v161_v40 }
 0x130   :  { %165 = vst.msk [vmem:[#allocation2 + $0x8] sm:$0xff] %vm45_vm0, %v162_v41 }
 0x131   :  { %178 = dma.vmem_to_hbm [thread:$0]  %s171_s18, 256, %s173_s21, [#allocation3], %s271_s22, %s271_s22, %s272_s23  }
 0x132   :  { %268 = dma.done.wait [#allocation3], 256  }
 0x133   :  { %269 = vsyncadd [#allocation3], 4294967040 }
 0x134   :  { %183 = vsyncpa [#allocation3], 1 }

</bundles_post_ra>
